<compile_context>
chip_gen: v7x
topology: tpu7x:2x2x1
jax: 0.10.0
libtpu: 0.0.40
codegen_flags: <defaults>
</compile_context>

<pallas_src>
import functools

import jax
import jax.numpy as jnp
from jax.experimental import pallas as pl
from jax.experimental.pallas import tpu as pltpu


def _round_up(x, m):
    return (x + m - 1) // m * m


def _attention_kernel(x_ref, wqkv_ref, wproj_ref, bproj_ref, o_ref, *,
                      num_heads, compute_dtype):
    Bt, N, Cp = x_ref.shape
    H = num_heads
    three_c = wqkv_ref.shape[0]
    C = three_c // 3
    D = C // H
    G = Bt * H
    M = Bt * N
    Cout = wproj_ref.shape[-1]

    x = x_ref[...].astype(compute_dtype)              # (Bt, N, Cp), lane-dense
    wqkv = wqkv_ref[...].astype(compute_dtype)        # (3C, Cp), Q rows pre-scaled

    # Fused QKV per batch element, feature-major (3C, N): the head split below is
    # then a free sublane slice + leading-dim reshape (no lane-dim relayout).
    # TODO(synk): when N % 128 == 0 a single fused (3C, Bt*N) dot becomes better.
    qkv = jnp.stack(
        [jnp.einsum('fc,nc->fn', wqkv, x[b], preferred_element_type=jnp.float32)
         for b in range(Bt)],
        axis=0)                                        # (Bt, 3C, N) f32

    # Per-(batch, head) views: sublane slices + leading splits (free; the wrapper
    # asserts D % 8 == 0 and N % 8 == 0).
    q = qkv[:, 0 * C:1 * C, :].reshape(G, D, N).astype(compute_dtype)
    k = qkv[:, 1 * C:2 * C, :].reshape(G, D, N).astype(compute_dtype)
    v = qkv[:, 2 * C:3 * C, :].reshape(G, D, N).astype(compute_dtype)

    # Attention scores, batched over G = Bt*H; contraction over D.
    scores = jnp.einsum('gdi,gdj->gij', q, k,
                        preferred_element_type=jnp.float32)        # (G, N, N) f32

    # Numerically stable softmax in f32; normalization deferred to the (G, N, D)
    # PV output (N >> D) instead of scaling the (G, N, N) probs.
    m = jnp.max(scores, axis=-1, keepdims=True)
    p = jnp.exp(scores - m)                                        # unnormalized
    s = jnp.sum(p, axis=-1, keepdims=True)
    inv = pl.reciprocal(s, approx=True)
    inv = inv * (2.0 - s * inv)            # one Newton step -> ~full f32 precision
    # TODO(synk): attention dropout / projection dropout are identity (eval mode).

    # PV: big probs operand stays native (lhs, minor contraction); only the small
    # (D, N) v tiles may be transposed by the compiler.
    o = jnp.einsum('gij,gdj->gid', p.astype(compute_dtype), v,
                   preferred_element_type=jnp.float32)             # (G, N, D) f32
    o = o * inv                                                    # post-PV norm
    o = o.reshape(Bt, H, N, D).astype(compute_dtype)

    # Output projection folded per head: H accumulated native dots over
    # leading-dim head slices, so 'b h n d -> b n (h d)' is never materialized.
    wproj = wproj_ref[...].astype(compute_dtype)                   # (H, D, Cout)
    y = jnp.zeros((M, Cout), jnp.float32)
    for h in range(H):
        y = y + jnp.dot(o[:, h].reshape(M, D), wproj[h],
                        preferred_element_type=jnp.float32)
    y = y + bproj_ref[...].astype(jnp.float32)                     # (1, Cout) bcast
    o_ref[...] = y.reshape(Bt, N, Cout).astype(o_ref.dtype)        # lane-dense store


def prepare_attention_params(w_qkv, w_proj, b_proj, *, num_heads,
                             param_dtype=jnp.float32):
    """One-time parameter transform (torch layouts in, kernel layouts out).

    w_qkv : (3C, C) == nn.Linear(dim, 3*dim, bias=False).weight
    w_proj: (C, C)  == nn.Linear(dim, dim).weight
    b_proj: (C,)    == nn.Linear(dim, dim).bias
    """
    three_c, C = w_qkv.shape
    assert three_c == 3 * C, "w_qkv must have shape (3*dim, dim)"
    assert C % num_heads == 0, "dim must be divisible by num_heads"
    D = C // num_heads
    scale = float(D) ** -0.5
    Cp = _round_up(C, 128)       # contraction (input-feature) padding
    Cout = _round_up(C, 128)     # output-feature padding -> lane-dense stores

    # Fold the attention scale into the Q rows; zero-pad the contraction columns.
    w_qkv_scaled = jnp.concatenate([w_qkv[:C] * scale, w_qkv[C:]], axis=0)
    w_qkv_p = jnp.pad(w_qkv_scaled, ((0, 0), (0, Cp - C)))          # (3C, Cp)

    # Projection stored as per-head (D, Cout) blocks of W^T, output lanes padded.
    w_proj_t = jnp.pad(w_proj.T, ((0, 0), (0, Cout - C)))           # (C, Cout)
    w_proj_h = w_proj_t.reshape(num_heads, D, Cout)                 # (H, D, Cout)
    b = jnp.pad(b_proj, (0, Cout - C)).reshape(1, Cout)             # (1, Cout)
    return (w_qkv_p.astype(param_dtype),
            w_proj_h.astype(param_dtype),
            b.astype(jnp.float32))


def _vmem_limit_bytes():
    try:
        phys = int(pltpu.get_tpu_info().vmem_capacity_bytes)
    except Exception:
        phys = 64 * 1024 * 1024            # conservative (v7x per-core VMEM)
    # ~100 MiB on 128 MiB generations (v5e/v6e), ~51 MiB on v7x's 64 MiB.
    return min(int(phys * 0.8), 112 * 1024 * 1024)


def _vmem_estimate(Bt, N, C, Cp, Cout, H, x_bytes, w_bytes, c_bytes):
    """Per-step working-set estimate, counting all simultaneously-live f32
    (G, N, N) temporaries (scores, p, + slack) plus blocks, weights, casts."""
    M = Bt * N
    S = Bt * H * N * N
    est = 2 * M * Cp * x_bytes + 2 * M * Cout * x_bytes            # x / out blocks
    est += 2 * (3 * C * Cp + C * Cout + Cout) * w_bytes            # resident weights
    est += (4 + c_bytes) * 3 * C * M                               # qkv f32 + casts
    est += (3 * 4 + c_bytes) * S                                   # scores + p + slack
    est += (2 * 4 + c_bytes) * M * C                               # o f32 + cast + slack
    est += 4 * M * Cout                                            # y accumulator
    return est


def _pick_batch_tile(B, N, C, Cp, Cout, H, x_bytes, w_bytes, c_bytes, vmem_limit):
    budget = int(0.7 * vmem_limit)
    best = 0
    for bt in range(1, min(B, 32) + 1):
        if B % bt != 0:
            continue
        if _vmem_estimate(bt, N, C, Cp, Cout, H,
                          x_bytes, w_bytes, c_bytes) > budget:
            break
        best = bt
        if bt * N >= 256:          # enough tokens per step to fill the MXU rows
            break
    if best == 0:
        raise ValueError(
            "attention working set too large for a single (N, N) block even at "
            f"batch_tile=1 (N={N}, C={C}, heads={H}); tile the sequence dim "
            "(flash-style) instead.")
    return best


@functools.lru_cache(maxsize=None)
def _build_attention_call(B, N, C, Cp, Cout, H, x_dtype_name, w_dtype_name,
                          c_dtype_name):
    x_dtype = jnp.dtype(x_dtype_name)
    w_dtype = jnp.dtype(w_dtype_name)
    compute_dtype = jnp.dtype(c_dtype_name)
    x_bytes = x_dtype.itemsize
    w_bytes = w_dtype.itemsize
    c_bytes = compute_dtype.itemsize

    vmem_limit = _vmem_limit_bytes()
    Bt = _pick_batch_tile(B, N, C, Cp, Cout, H,
                          x_bytes, w_bytes, c_bytes, vmem_limit)

    kernel = functools.partial(_attention_kernel, num_heads=H,
                               compute_dtype=compute_dtype)

    flops = int(B * (6 * N * C * Cp + 4 * N * N * C + 2 * N * C * Cout))
    transcendentals = int(B * H * N * N)
    bytes_accessed = int(B * N * (Cp + Cout) * x_bytes
                         + (3 * C * Cp + C * Cout + Cout) * w_bytes)

    grid_spec = pltpu.PrefetchScalarGridSpec(
        num_scalar_prefetch=0,
        grid=(B // Bt,),
        in_specs=[
            pl.BlockSpec((Bt, N, Cp), lambda i: (i, 0, 0)),          # x (padded)
            pl.BlockSpec((3 * C, Cp), lambda i: (0, 0)),             # W_qkv (scaled Q)
            pl.BlockSpec((H, C // H, Cout), lambda i: (0, 0, 0)),    # W_proj^T / head
            pl.BlockSpec((1, Cout), lambda i: (0, 0)),               # proj bias
        ],
        out_specs=pl.BlockSpec((Bt, N, Cout), lambda i: (i, 0, 0)),
    )
    return pl.pallas_call(
        kernel,
        out_shape=jax.ShapeDtypeStruct((B, N, Cout), x_dtype),
        grid_spec=grid_spec,
        compiler_params=pltpu.CompilerParams(
            dimension_semantics=("parallel",),
            vmem_limit_bytes=vmem_limit),
        cost_estimate=pl.CostEstimate(flops=flops,
                                      transcendentals=transcendentals,
                                      bytes_accessed=bytes_accessed),
    )


def attention_pallas(x, w_qkv_p, w_proj_p, b_proj_p, *, num_heads,
                     compute_dtype=jnp.bfloat16):
    """Multi-head self-attention forward (eval mode).

    Returns a lane-padded (B, N, round_up(C, 128)) slab so the final store stays
    lane-dense; downstream ops should consume (or fuse the depad of) [..., :C].
    """
    B, N, C = x.shape
    three_c, Cp = w_qkv_p.shape
    H, D, Cout = w_proj_p.shape
    assert three_c == 3 * C, "w_qkv_p / x feature dims disagree"
    assert H == num_heads and H * D == C, "w_proj_p layout disagrees with num_heads"
    assert N % 8 == 0, "N must be a multiple of 8"   # TODO(synk): pad+mask ragged N
    assert D % 8 == 0, "head_dim must be a multiple of 8"

    if Cp != C:
        # TODO(synk): have the producing op emit Cp-padded activations instead.
        x = jnp.pad(x, ((0, 0), (0, 0), (0, Cp - C)))

    call = _build_attention_call(B, N, C, Cp, Cout, H,
                                 jnp.dtype(x.dtype).name,
                                 jnp.dtype(w_qkv_p.dtype).name,
                                 jnp.dtype(compute_dtype).name)
    return call(x, w_qkv_p, w_proj_p, b_proj_p)       # async; no host sync here


def attention_reference(x, w_qkv, w_proj, b_proj, *, num_heads):
    """Pure-JAX f32 forward mirroring the PyTorch module (eval mode)."""
    B, N, C = x.shape
    H = num_heads
    D = C // H
    scale = float(D) ** -0.5
    qkv = x @ w_qkv.T                                   # (B, N, 3C)
    q, k, v = jnp.split(qkv, 3, axis=-1)

    def to_heads(t):  # 'b n (h d) -> b h n d'
        return t.reshape(B, N, H, D).transpose(0, 2, 1, 3)

    q, k, v = to_heads(q) * scale, to_heads(k), to_heads(v)
    attn = jnp.einsum('bhid,bhjd->bhij', q, k)
    attn = jax.nn.softmax(attn, axis=-1)
    out = jnp.einsum('bhij,bhjd->bhid', attn, v)
    out = out.transpose(0, 2, 1, 3).reshape(B, N, C)
    return out @ w_proj.T + b_proj


if __name__ == "__main__":
    B, N, C = 2, 8, 32
    num_heads = 4

    key = jax.random.PRNGKey(0)
    kx, kqkv, kproj, kb = jax.random.split(key, 4)

    x = jax.random.normal(kx, (B, N, C), dtype=jnp.float32)
    # torch parameter layouts:
    w_qkv = jax.random.normal(kqkv, (3 * C, C), dtype=jnp.float32) * 0.1   # qkv.weight
    w_proj = jax.random.normal(kproj, (C, C), dtype=jnp.float32) * 0.1     # proj.weight
    b_proj = jax.random.normal(kb, (C,), dtype=jnp.float32) * 0.1          # proj.bias

    ref = attention_reference(x, w_qkv, w_proj, b_proj, num_heads=num_heads)

    # f32 compute path (tight numerical check).
    params32 = prepare_attention_params(w_qkv, w_proj, b_proj,
                                        num_heads=num_heads,
                                        param_dtype=jnp.float32)
    out32 = attention_pallas(x, *params32, num_heads=num_heads,
                             compute_dtype=jnp.float32)
    out32 = jax.block_until_ready(out32)[..., :C]
    assert out32.shape == (B, N, C)
    assert jnp.allclose(out32, ref, atol=1e-3, rtol=1e-3), "f32 mismatch vs reference"

    # bf16 matmul path (MXU-native rate), f32 accumulation; looser check.
    params16 = prepare_attention_params(w_qkv, w_proj, b_proj,
                                        num_heads=num_heads,
                                        param_dtype=jnp.bfloat16)
    out16 = attention_pallas(x.astype(jnp.bfloat16), *params16,
                             num_heads=num_heads, compute_dtype=jnp.bfloat16)
    out16 = jax.block_until_ready(out16)[..., :C]
    assert out16.shape == (B, N, C)
    assert jnp.allclose(out16.astype(jnp.float32), ref, atol=5e-2, rtol=5e-2), \
        "bf16 mismatch vs reference"

    print("KERNEL_OK")
</pallas_src>

<mosaic_0001>
module attributes {stable_mosaic.version = 11 : i64} {
  func.func @_attention_kernel(%arg0: i32, %arg1: memref<2x8x128xf32, #tpu.memory_space<vmem>>, %arg2: memref<96x128xf32, #tpu.memory_space<vmem>>, %arg3: memref<4x8x128xf32, #tpu.memory_space<vmem>>, %arg4: memref<1x128xf32, #tpu.memory_space<vmem>>, %arg5: memref<2x8x128xf32, #tpu.memory_space<vmem>>) attributes {dimension_semantics = [#tpu.dimension_semantics<parallel>], iteration_bounds = array<i64: 1>, scalar_prefetch = 0 : i64, scratch_operands = 0 : i64, tpu.core_type = #tpu.core_type<tc>, window_params = [{transform_indices = @transform_0, window_bounds = array<i64: 2, 8, 128>}, {pipeline_mode = #tpu.pipeline_mode<synchronous>, transform_indices = @transform_1, window_bounds = array<i64: 96, 128>}, {pipeline_mode = #tpu.pipeline_mode<synchronous>, transform_indices = @transform_2, window_bounds = array<i64: 4, 8, 128>}, {pipeline_mode = #tpu.pipeline_mode<synchronous>, transform_indices = @transform_3, window_bounds = array<i64: 1, 128>}, {transform_indices = @transform_4, window_bounds = array<i64: 2, 8, 128>}]} {
    %c0 = arith.constant 0 : index
    %c0_0 = arith.constant 0 : index
    %c0_1 = arith.constant 0 : index
    %0 = vector.load %arg1[%c0, %c0_0, %c0_1] : memref<2x8x128xf32, #tpu.memory_space<vmem>>, vector<2x8x128xf32>
    %c0_2 = arith.constant 0 : index
    %c0_3 = arith.constant 0 : index
    %1 = vector.load %arg2[%c0_2, %c0_3] : memref<96x128xf32, #tpu.memory_space<vmem>>, vector<96x128xf32>
    %2 = vector.extract_strided_slice %0 {offsets = [0, 0, 0], sizes = [1, 8, 128], strides = [1, 1, 1]} : vector<2x8x128xf32> to vector<1x8x128xf32>
    %3 = vector.shape_cast %2 : vector<1x8x128xf32> to vector<8x128xf32>
    "tpu.trace_start"() <{level = 10 : i32, message = "fc,nc->fn"}> : () -> ()
    %cst = arith.constant dense<0.000000e+00> : vector<96x8xf32>
    %4 = tpu.matmul %1, %3, %cst {dimension_numbers = #tpu.dot_dimension_numbers<[1], [1], [0], [0], [0, 0, 1, 0], [], []>} : vector<96x128xf32>, vector<8x128xf32>, vector<96x8xf32> -> vector<96x8xf32>
    "tpu.trace_stop"() : () -> ()
    %5 = vector.extract_strided_slice %0 {offsets = [1, 0, 0], sizes = [1, 8, 128], strides = [1, 1, 1]} : vector<2x8x128xf32> to vector<1x8x128xf32>
    %6 = vector.shape_cast %5 : vector<1x8x128xf32> to vector<8x128xf32>
    "tpu.trace_start"() <{level = 10 : i32, message = "fc,nc->fn"}> : () -> ()
    %cst_4 = arith.constant dense<0.000000e+00> : vector<96x8xf32>
    %7 = tpu.matmul %1, %6, %cst_4 {dimension_numbers = #tpu.dot_dimension_numbers<[1], [1], [0], [0], [0, 0, 1, 0], [], []>} : vector<96x128xf32>, vector<8x128xf32>, vector<96x8xf32> -> vector<96x8xf32>
    "tpu.trace_stop"() : () -> ()
    %8 = vector.shape_cast %4 : vector<96x8xf32> to vector<1x96x8xf32>
    %9 = vector.shape_cast %7 : vector<96x8xf32> to vector<1x96x8xf32>
    %10 = tpu.concatenate %8, %9 in 0 : vector<1x96x8xf32>, vector<1x96x8xf32> -> vector<2x96x8xf32>
    %11 = vector.extract_strided_slice %10 {offsets = [0, 0, 0], sizes = [2, 32, 8], strides = [1, 1, 1]} : vector<2x96x8xf32> to vector<2x32x8xf32>
    %12 = vector.shape_cast %11 : vector<2x32x8xf32> to vector<8x8x8xf32>
    %13 = vector.extract_strided_slice %10 {offsets = [0, 32, 0], sizes = [2, 32, 8], strides = [1, 1, 1]} : vector<2x96x8xf32> to vector<2x32x8xf32>
    %14 = vector.shape_cast %13 : vector<2x32x8xf32> to vector<8x8x8xf32>
    %15 = vector.extract_strided_slice %10 {offsets = [0, 64, 0], sizes = [2, 32, 8], strides = [1, 1, 1]} : vector<2x96x8xf32> to vector<2x32x8xf32>
    %16 = vector.shape_cast %15 : vector<2x32x8xf32> to vector<8x8x8xf32>
    "tpu.trace_start"() <{level = 10 : i32, message = "gdi,gdj->gij"}> : () -> ()
    %cst_5 = arith.constant dense<0.000000e+00> : vector<8x8x8xf32>
    %17 = tpu.matmul %12, %14, %cst_5 {dimension_numbers = #tpu.dot_dimension_numbers<[1], [1], [2], [2], [0, 0, 0, 2, 1, 2], [0], [0]>} : vector<8x8x8xf32>, vector<8x8x8xf32>, vector<8x8x8xf32> -> vector<8x8x8xf32>
    "tpu.trace_stop"() : () -> ()
    %cst_6 = arith.constant dense<0xFF800000> : vector<8x8xf32>
    %18 = vector.multi_reduction <maximumf>, %17, %cst_6 [2] : vector<8x8x8xf32> to vector<8x8xf32>
    %19 = vector.shape_cast %18 : vector<8x8xf32> to vector<8x8x1xf32>
    %20 = vector.broadcast %19 : vector<8x8x1xf32> to vector<8x8x8xf32>
    %21 = arith.subf %17, %20 : vector<8x8x8xf32>
    %22 = math.exp %21 : vector<8x8x8xf32>
    %cst_7 = arith.constant dense<0.000000e+00> : vector<8x8xf32>
    %23 = vector.multi_reduction <add>, %22, %cst_7 [2] : vector<8x8x8xf32> to vector<8x8xf32>
    %24 = vector.shape_cast %23 : vector<8x8xf32> to vector<8x8x1xf32>
    %25 = tpu.reciprocal %24 {approx = true} : vector<8x8x1xf32> -> vector<8x8x1xf32>
    %26 = arith.mulf %24, %25 : vector<8x8x1xf32>
    %cst_8 = arith.constant 2.000000e+00 : f32
    %27 = vector.broadcast %cst_8 : f32 to vector<8x8x1xf32>
    %28 = arith.subf %27, %26 : vector<8x8x1xf32>
    %29 = arith.mulf %25, %28 : vector<8x8x1xf32>
    "tpu.trace_start"() <{level = 10 : i32, message = "gij,gdj->gid"}> : () -> ()
    %cst_9 = arith.constant dense<0.000000e+00> : vector<8x8x8xf32>
    %30 = tpu.matmul %22, %16, %cst_9 {dimension_numbers = #tpu.dot_dimension_numbers<[2], [2], [1], [1], [0, 0, 0, 1, 1, 1], [0], [0]>} : vector<8x8x8xf32>, vector<8x8x8xf32>, vector<8x8x8xf32> -> vector<8x8x8xf32>
    "tpu.trace_stop"() : () -> ()
    %31 = vector.broadcast %29 : vector<8x8x1xf32> to vector<8x8x8xf32>
    %32 = arith.mulf %30, %31 : vector<8x8x8xf32>
    %33 = vector.shape_cast %32 : vector<8x8x8xf32> to vector<2x4x8x8xf32>
    %c0_10 = arith.constant 0 : index
    %c0_11 = arith.constant 0 : index
    %c0_12 = arith.constant 0 : index
    %34 = vector.load %arg3[%c0_10, %c0_11, %c0_12] : memref<4x8x128xf32, #tpu.memory_space<vmem>>, vector<4x8x128xf32>
    %cst_13 = arith.constant 0.000000e+00 : f32
    %35 = vector.broadcast %cst_13 : f32 to vector<16x128xf32>
    %36 = vector.extract_strided_slice %33 {offsets = [0, 0, 0, 0], sizes = [2, 1, 8, 8], strides = [1, 1, 1, 1]} : vector<2x4x8x8xf32> to vector<2x1x8x8xf32>
    %37 = vector.shape_cast %36 : vector<2x1x8x8xf32> to vector<2x8x8xf32>
    %38 = vector.shape_cast %37 : vector<2x8x8xf32> to vector<16x8xf32>
    %39 = vector.extract_strided_slice %34 {offsets = [0, 0, 0], sizes = [1, 8, 128], strides = [1, 1, 1]} : vector<4x8x128xf32> to vector<1x8x128xf32>
    %40 = vector.shape_cast %39 : vector<1x8x128xf32> to vector<8x128xf32>
    %cst_14 = arith.constant dense<0.000000e+00> : vector<16x128xf32>
    %41 = tpu.matmul %38, %40, %cst_14 {dimension_numbers = #tpu.dot_dimension_numbers<[1], [0], [0], [1], [0, 0, 1, 1], [], []>} : vector<16x8xf32>, vector<8x128xf32>, vector<16x128xf32> -> vector<16x128xf32>
    %42 = arith.addf %35, %41 : vector<16x128xf32>
    %43 = vector.extract_strided_slice %33 {offsets = [0, 1, 0, 0], sizes = [2, 1, 8, 8], strides = [1, 1, 1, 1]} : vector<2x4x8x8xf32> to vector<2x1x8x8xf32>
    %44 = vector.shape_cast %43 : vector<2x1x8x8xf32> to vector<2x8x8xf32>
    %45 = vector.shape_cast %44 : vector<2x8x8xf32> to vector<16x8xf32>
    %46 = vector.extract_strided_slice %34 {offsets = [1, 0, 0], sizes = [1, 8, 128], strides = [1, 1, 1]} : vector<4x8x128xf32> to vector<1x8x128xf32>
    %47 = vector.shape_cast %46 : vector<1x8x128xf32> to vector<8x128xf32>
    %cst_15 = arith.constant dense<0.000000e+00> : vector<16x128xf32>
    %48 = tpu.matmul %45, %47, %cst_15 {dimension_numbers = #tpu.dot_dimension_numbers<[1], [0], [0], [1], [0, 0, 1, 1], [], []>} : vector<16x8xf32>, vector<8x128xf32>, vector<16x128xf32> -> vector<16x128xf32>
    %49 = arith.addf %42, %48 : vector<16x128xf32>
    %50 = vector.extract_strided_slice %33 {offsets = [0, 2, 0, 0], sizes = [2, 1, 8, 8], strides = [1, 1, 1, 1]} : vector<2x4x8x8xf32> to vector<2x1x8x8xf32>
    %51 = vector.shape_cast %50 : vector<2x1x8x8xf32> to vector<2x8x8xf32>
    %52 = vector.shape_cast %51 : vector<2x8x8xf32> to vector<16x8xf32>
    %53 = vector.extract_strided_slice %34 {offsets = [2, 0, 0], sizes = [1, 8, 128], strides = [1, 1, 1]} : vector<4x8x128xf32> to vector<1x8x128xf32>
    %54 = vector.shape_cast %53 : vector<1x8x128xf32> to vector<8x128xf32>
    %cst_16 = arith.constant dense<0.000000e+00> : vector<16x128xf32>
    %55 = tpu.matmul %52, %54, %cst_16 {dimension_numbers = #tpu.dot_dimension_numbers<[1], [0], [0], [1], [0, 0, 1, 1], [], []>} : vector<16x8xf32>, vector<8x128xf32>, vector<16x128xf32> -> vector<16x128xf32>
    %56 = arith.addf %49, %55 : vector<16x128xf32>
    %57 = vector.extract_strided_slice %33 {offsets = [0, 3, 0, 0], sizes = [2, 1, 8, 8], strides = [1, 1, 1, 1]} : vector<2x4x8x8xf32> to vector<2x1x8x8xf32>
    %58 = vector.shape_cast %57 : vector<2x1x8x8xf32> to vector<2x8x8xf32>
    %59 = vector.shape_cast %58 : vector<2x8x8xf32> to vector<16x8xf32>
    %60 = vector.extract_strided_slice %34 {offsets = [3, 0, 0], sizes = [1, 8, 128], strides = [1, 1, 1]} : vector<4x8x128xf32> to vector<1x8x128xf32>
    %61 = vector.shape_cast %60 : vector<1x8x128xf32> to vector<8x128xf32>
    %cst_17 = arith.constant dense<0.000000e+00> : vector<16x128xf32>
    %62 = tpu.matmul %59, %61, %cst_17 {dimension_numbers = #tpu.dot_dimension_numbers<[1], [0], [0], [1], [0, 0, 1, 1], [], []>} : vector<16x8xf32>, vector<8x128xf32>, vector<16x128xf32> -> vector<16x128xf32>
    %63 = arith.addf %56, %62 : vector<16x128xf32>
    %c0_18 = arith.constant 0 : index
    %c0_19 = arith.constant 0 : index
    %64 = vector.load %arg4[%c0_18, %c0_19] : memref<1x128xf32, #tpu.memory_space<vmem>>, vector<1x128xf32>
    %65 = vector.broadcast %64 : vector<1x128xf32> to vector<16x128xf32>
    %66 = arith.addf %63, %65 : vector<16x128xf32>
    %67 = vector.shape_cast %66 : vector<16x128xf32> to vector<2x8x128xf32>
    %c0_20 = arith.constant 0 : index
    %c0_21 = arith.constant 0 : index
    %c0_22 = arith.constant 0 : index
    %68 = vector.load %arg5[%c0_20, %c0_21, %c0_22] : memref<2x8x128xf32, #tpu.memory_space<vmem>>, vector<2x8x128xf32>
    tpu.vector_store %arg5[%c0_20, %c0_21, %c0_22], %67 {strides = array<i32>} : memref<2x8x128xf32, #tpu.memory_space<vmem>>, vector<2x8x128xf32>,
    return
  }
  func.func @transform_0(%arg0: i32) -> (i32, i32, i32) {
    %c0_i32 = arith.constant 0 : i32
    %c0_i32_0 = arith.constant 0 : i32
    %c0_i32_1 = arith.constant 0 : i32
    return %arg0, %c0_i32, %c0_i32_0 : i32, i32, i32
  }
  func.func @transform_1(%arg0: i32) -> (i32, i32) {
    %c0_i32 = arith.constant 0 : i32
    %c0_i32_0 = arith.constant 0 : i32
    %c0_i32_1 = arith.constant 0 : i32
    return %c0_i32, %c0_i32_0 : i32, i32
  }
  func.func @transform_2(%arg0: i32) -> (i32, i32, i32) {
    %c0_i32 = arith.constant 0 : i32
    %c0_i32_0 = arith.constant 0 : i32
    %c0_i32_1 = arith.constant 0 : i32
    %c0_i32_2 = arith.constant 0 : i32
    return %c0_i32, %c0_i32_0, %c0_i32_1 : i32, i32, i32
  }
  func.func @transform_3(%arg0: i32) -> (i32, i32) {
    %c0_i32 = arith.constant 0 : i32
    %c0_i32_0 = arith.constant 0 : i32
    %c0_i32_1 = arith.constant 0 : i32
    return %c0_i32, %c0_i32_0 : i32, i32
  }
  func.func @transform_4(%arg0: i32) -> (i32, i32, i32) {
    %c0_i32 = arith.constant 0 : i32
    %c0_i32_0 = arith.constant 0 : i32
    %c0_i32_1 = arith.constant 0 : i32
    return %arg0, %c0_i32, %c0_i32_0 : i32, i32, i32
  }
}

</mosaic_0001>

<bundles_post_ra>
// kernel: tpu_custom_call.1
= control target key start
LH: loop header
LB: loop body
LE: loop exit
PB: predicated region body
PF: predicated region fallthrough
CT: control target
= control target key end

     0   :  { %9 = vsyncpa [#allocation3], 0  ;;  %s2853_s0 = inlined_call_operand.hbm [shape: f32[2,8,128], index: 0, kind: input, shape index: {}]   ;;  %s2854_s1 = inlined_call_operand.hbm [shape: f32[96,128], index: 1, kind: input, shape index: {}]   ;;  %s2855_s2 = inlined_call_operand.hbm [shape: f32[4,8,128], index: 2, kind: input, shape index: {}]   ;;  %s2856_s3 = inlined_call_operand.vmem [shape: f32[1,128], index: 3, kind: input, shape index: {}]   ;;  %s2857_s4 = inlined_call_operand.hbm [shape: f32[2,8,128], index: 4, kind: output, shape index: {}]  }
   0x1   :  { %10 = vsyncpa [#allocation6], 0 }
   0x2   :  { %11 = vsyncpa [#allocation4], 0  ;;  %s2630_s15 = smov [#allocation5]   ;;  %s2631_s17 = smov [#allocation2]  }
   0x3   :  { %s29_s16 = sshll.u32 %s2630_s15, 4  ;;  %s17_s18 = sshll.u32 %s2631_s17, 4  ;;  %s30_s16 = int_to_ptr.vmem [resolvable:$true] %s29_s16  ;;  %s2663_s18 = int_to_ptr.vmem [resolvable:$true] %s17_s18 }
   0x4   :  { %s2536_s21 = scalar_lea.hbm %s2854_s1, 1536 }
   0x5   :  { %p2537_p0 = scmp.ne.s32.totalorder %s2854_s1, %s2536_s21  ;;  %p2540_p1 = scmp.lt.u32.totalorder %s2536_s21, %s2854_s1 }
   0x7   :  { %p2542_p2 = pnand %p2540_p1, %p2537_p0 }
   0x9   :  { %2545 = shalt.err (!%p2542_p2)
}
   0xa   :  { %s2546_s26 = scalar_lea.vmem %s30_s16, 1536  ;;  %p2551_p4 = scmp.lt.s32.totalorder %s30_s16, %s30_s16 }
   0xb   :  { %p2547_p3 = scmp.ne.s32.totalorder %s30_s16, %s2546_s26  ;;  %p2552_p5 = scmp.lt.s32.totalorder %s2546_s26, %s2546_s26 }
   0xd   :  { %p2553_p6 = por %p2552_p5, %p2551_p4 }
   0xf   :  { %p2554_p7 = pnand %p2553_p6, %p2547_p3 }
  0x11   :  { %2557 = shalt.err (!%p2554_p7)
}
  0x12   :  { %s2632_s27 = smov 128   ;;  %s2633_s28 = smov 8  }
  0x13   :  { %35 = dma.hbm_to_vmem [thread:$0]  %s2854_s1, 1536, %s30_s16, [#allocation6], %s2632_s27, %s2632_s27, %s2633_s28  }
  0x14   :  { %s2558_s7 = scalar_lea.hbm %s2853_s0, 256 }
  0x15   :  { %p2559_p8 = scmp.ne.s32.totalorder %s2853_s0, %s2558_s7  ;;  %p2562_p9 = scmp.lt.u32.totalorder %s2558_s7, %s2853_s0 }
  0x17   :  { %p2564_p10 = pnand %p2562_p9, %p2559_p8 }
  0x19   :  { %2567 = shalt.err (!%p2564_p10)
}
  0x1a   :  { %s2568_s12 = scalar_lea.vmem %s2663_s18, 256  ;;  %p2573_p12 = scmp.lt.s32.totalorder %s2663_s18, %s2663_s18 }
  0x1b   :  { %p2569_p11 = scmp.ne.s32.totalorder %s2663_s18, %s2568_s12  ;;  %p2574_p13 = scmp.lt.s32.totalorder %s2568_s12, %s2568_s12 }
  0x1d   :  { %p2575_p0 = por %p2574_p13, %p2573_p12 }
  0x1f   :  { %p2576_p1 = pnand %p2575_p0, %p2569_p11 }
  0x21   :  { %2579 = shalt.err (!%p2576_p1)
}
  0x22   :  { %23 = dma.hbm_to_vmem [thread:$0]  %s2853_s0, 256, %s2663_s18, [#allocation3], %s2632_s27, %s2632_s27, %s2633_s28  }
  0x23   :  { %s2634_s14 = smov [#allocation7]   ;;  %s2580_s19 = scalar_lea.hbm %s2855_s2, 512 }
  0x24   :  { %s41_s15 = sshll.u32 %s2634_s14, 4  ;;  %p2581_p2 = scmp.ne.s32.totalorder %s2855_s2, %s2580_s19  ;;  %s42_s15 = int_to_ptr.vmem [resolvable:$true] %s41_s15 }
  0x25   :  { %p2584_p3 = scmp.lt.u32.totalorder %s2580_s19, %s2855_s2 }
  0x27   :  { %p2586_p4 = pnand %p2584_p3, %p2581_p2 }
  0x29   :  { %2589 = shalt.err (!%p2586_p4)
}
  0x2a   :  { %s2590_s24 = scalar_lea.vmem %s42_s15, 512  ;;  %p2595_p6 = scmp.lt.s32.totalorder %s42_s15, %s42_s15 }
  0x2b   :  { %p2591_p5 = scmp.ne.s32.totalorder %s42_s15, %s2590_s24  ;;  %p2596_p7 = scmp.lt.s32.totalorder %s2590_s24, %s2590_s24 }
  0x2d   :  { %p2597_p8 = por %p2596_p7, %p2595_p6 }
  0x2f   :  { %p2598_p9 = pnand %p2597_p8, %p2591_p5 }
  0x31   :  { %2601 = shalt.err (!%p2598_p9)
}
  0x32   :  { %47 = dma.hbm_to_vmem [thread:$0]  %s2855_s2, 512, %s42_s15, [#allocation6], %s2632_s27, %s2632_s27, %s2633_s28  }
  0x33   :  { %2624 = dma.done.wait [#allocation3], 256  }
  0x34   :  { %2625 = vsyncadd [#allocation3], 4294967040 }
  0x35   :  { %2626 = dma.done.wait [#allocation6], 2048  }
  0x36   :  { %2627 = vsyncadd [#allocation6], 4294965248  ;;  %v59_v0 = vld [vmem:[#allocation2] sm:$0xff]  ;;  %v61_v1 = vld [vmem:[#allocation5] sm:$0xff]  ;;  %v2635_v14 = vmov 0.0   ;;  %vm2636_vm0 = vmmov 0  }
  0x37   :  { %v69_v2 = vld [vmem:[#allocation5 + $0x40] sm:$0xff]  ;;  %2348 = vmatprep.subr.mxu0 %v59_v0  ;;  %2488 = vmatprep.subr.mxu1 %v59_v0  ;;  %v60_v3 = vld [vmem:[#allocation2 + $0x8] sm:$0xff]  ;;  %v62_v4 = vld [vmem:[#allocation5 + $0x8] sm:$0xff]  ;;  %vm355_vm1 = vcmask 64512   ;;  %s2637_s26 = smov [#allocation8]  }
  0x38   :  { %2349 = vmatpush3.xpose.msra.mxu0 %v59_v0  ;;  %2489 = vmatpush3.xpose.msra.mxu1 %v59_v0  ;;  %v70_v5 = vld [vmem:[#allocation5 + $0x48] sm:$0xff]  ;;  %v63_v6 = vld [vmem:[#allocation5 + $0x10] sm:$0xff]  ;;  %v64_v8 = vld [vmem:[#allocation5 + $0x18] sm:$0xff]  ;;  %s2232_s29 = sshll.u32 %s2637_s26, 4  ;;  %s2233_s29 = int_to_ptr.vmem [resolvable:$true] %s2232_s29 }
  0x39   :  { %2350 = vmatprep.mubr.f32.mxu0 %v61_v1  ;;  %2362 = vmatprep.mubr.f32.mxu1 %v69_v2  ;;  %v71_v7 = vld [vmem:[#allocation5 + $0x50] sm:$0xff]  ;;  %v72_v9 = vld [vmem:[#allocation5 + $0x58] sm:$0xff]  ;;  %v65_v10 = vld [vmem:[#allocation5 + $0x20] sm:$0xff]  ;;  %s2602_s30 = scalar_lea.vmem %s2233_s29, 256  ;;  %p2607_p11 = scmp.lt.s32.totalorder %s2233_s29, %s2233_s29 }
  0x3a   :  { %2368 = vmatprep.subr.mxu1 %v60_v3  ;;  %v66_v11 = vld [vmem:[#allocation5 + $0x28] sm:$0xff]  ;;  %v67_v12 = vld [vmem:[#allocation5 + $0x30] sm:$0xff]  ;;  %v68_v13 = vld [vmem:[#allocation5 + $0x38] sm:$0xff]  ;;  %2388 = vmatprep.subr.mxu0 %v2635_v14  ;;  %p2603_p10 = scmp.ne.s32.totalorder %s2233_s29, %s2602_s30  ;;  %p2608_p12 = scmp.lt.s32.totalorder %s2602_s30, %s2602_s30 }
  0x3b   :  { %2351 = vmatmul.mubr.f32.vlgmr.msra.gmra.mrb[0].mxu0 %v62_v4  ;;  %2363 = vmatmul.mubr.f32.vlgmr.msra.gmra.mrb[0].mxu1 %v70_v5 }
  0x3c   :  { %2369 = vmatpush3.xpose.msra.mxu1 %v60_v3  ;;  %2353 = vmatprep.mubr.f32.mxu0 %v63_v6  ;;  %p2609_p13 = por %p2608_p12, %p2607_p11 }
  0x3d   :  { %2365 = vmatprep.mubr.f32.mxu1 %v71_v7  ;;  %2393 = vmatprep.subr.mxu1 %v2635_v14 }
  0x3e   :  { %p2610_p0 = pnand %p2609_p13, %p2603_p10 }
  0x3f   :  { %2354 = vmatmul.mubr.f32.gmra.mrb[2].mxu0 %v64_v8  ;;  %2366 = vmatmul.mubr.f32.gmra.mrb[2].mxu1 %v72_v9 }
  0x40   :  { %2370 = vmatprep.mubr.f32.mxu1 %v61_v1  ;;  %2356 = vmatprep.mubr.f32.mxu0 %v65_v10 }
  0x43   :  { %2371 = vmatmul.mubr.f32.vlgmr.msra.gmra.mrb[4].mxu1 %v62_v4  ;;  %2357 = vmatmul.mubr.f32.gmra.mrb[4].mxu0 %v66_v11 }
  0x44   :  { %2373 = vmatprep.mubr.f32.mxu1 %v63_v6  ;;  %2359 = vmatprep.mubr.f32.mxu0 %v67_v12 }
  0x47   :  { %2374 = vmatmul.mubr.f32.gmra.mrb[6].mxu1 %v64_v8  ;;  %2360 = vmatmul.mubr.f32.gmra.mrb[6].mxu0 %v68_v13 }
  0x48   :  { %2376 = vmatprep.mubr.f32.mxu1 %v65_v10  ;;  %2390 = vmatprep.mubr.msk.f32.mxu0 %vm2636_vm0, %v2635_v14 }
  0x4b   :  { %2377 = vmatmul.mubr.f32.gmra.mrb[8].mxu1 %v66_v11 }
  0x4c   :  { %2379 = vmatprep.mubr.f32.mxu1 %v67_v12 }
  0x4f   :  { %2380 = vmatmul.mubr.f32.gmra.mrb[10].mxu1 %v68_v13 }
  0x50   :  { %2382 = vmatprep.mubr.f32.mxu1 %v69_v2 }
  0x53   :  { %2383 = vmatmul.mubr.f32.gmra.mrb[12].mxu1 %v70_v5 }
  0x54   :  { %2385 = vmatprep.mubr.f32.mxu1 %v71_v7 }
  0x57   :  { %2386 = vmatmul.mubr.f32.gmra.mrb[14].mxu1 %v72_v9 }
  0x58   :  { %2395 = vmatprep.mubr.msk.f32.mxu1 %vm2636_vm0, %v2635_v14 }
 0x10e   :  { %v2352_v15 = vpop.f32.mrb[0].mxu0  ;;  %v2721_v16 = vpop.f32.mrb[0].mxu1 }
 0x10f   :  { %v2723_v17 = vpop.f32.mrb[1].mxu1  ;;  %429 = vxpose.xlu0.b32.start.end [1/1] (short) (narrow) %v2352_v15, 8  ;;  %v139_v18 = vpop.f32.mrb[1].mxu0 }
 0x110   :  { %323 = vxpose.xlu1.b32.start.end [1/1] (short) (narrow) %v139_v18, 8 }
 0x112   :  { %v2355_v19 = vpop.f32.mrb[2].mxu0  ;;  %v2725_v20 = vpop.f32.mrb[2].mxu1 }
 0x113   :  { %v2727_v21 = vpop.f32.mrb[3].mxu1  ;;  %639 = vxpose.xlu0.b32.start.end [1/1] (short) (narrow) %v2355_v19, 8  ;;  %v149_v22 = vpop.f32.mrb[3].mxu0 }
 0x116   :  { %v2372_v23 = vpop.f32.mrb[4].mxu1  ;;  %v2358_v24 = vpop.f32.mrb[4].mxu0 }
 0x117   :  { %v264_v25 = vpop.f32.mrb[5].mxu1  ;;  %849 = vxpose.xlu1.b32.start.end [1/1] (short) (narrow) %v2372_v23, 8  ;;  %534 = vxpose.xlu0.b32.start.end [1/1] (short) (narrow) %v149_v22, 8  ;;  %v159_v26 = vpop.f32.mrb[5].mxu0 }
 0x118   :  { %2389 = vmatpush3.msra.mxu0 %v159_v26  ;;  %2394 = vmatpush3.msra.mxu1 %v2358_v24 }
 0x119   :  { %2398 = vmatprep.subr.mxu0 %v2635_v14  ;;  %2403 = vmatprep.subr.mxu1 %v2635_v14 }
 0x11a   :  { %v2375_v27 = vpop.f32.mrb[6].mxu1  ;;  %v2361_v28 = vpop.f32.mrb[6].mxu0 }
 0x11b   :  { %744 = vxpose.xlu1.b32.start.end [1/1] (short) (narrow) %v264_v25, 8  ;;  %v274_v29 = vpop.f32.mrb[7].mxu1  ;;  %v169_v30 = vpop.f32.mrb[7].mxu0 }
 0x11c   :  { %954 = vxpose.xlu0.b32.start.end [1/1] (short) (narrow) %v274_v29, 8 }
 0x11e   :  { %v2378_v31 = vpop.f32.mrb[8].mxu1 }
 0x11f   :  { %1059 = vxpose.xlu1.b32.start.end [1/1] (short) (narrow) %v2375_v27, 8  ;;  %v284_v32 = vpop.f32.mrb[9].mxu1 }
 0x122   :  { %v2381_v33 = vpop.f32.mrb[10].mxu1 }
 0x123   :  { %v294_v34 = vpop.f32.mrb[11].mxu1 }
 0x126   :  { %v2731_v35 = vpop.f32.mrb[12].mxu1 }
 0x127   :  { %v2733_v36 = vpop.f32.mrb[13].mxu1 }
 0x12a   :  { %v2735_v37 = vpop.f32.mrb[14].mxu1 }
 0x12b   :  { %v2737_v38 = vpop.f32.mrb[15].mxu1 }
 0x18f   :  { %v445_v39 = vpop.trf.xlu0 }
 0x190   :  { %v339_v40 = vpop.trf.xlu1  ;;  %2396 = vmatmul.mubr.msk.f32.vlgmr.msra.gmra.mrb[16].mxu1 %vm355_vm1, %v445_v39 }
 0x191   :  { %2391 = vmatmul.mubr.msk.f32.vlgmr.msra.gmra.mrb[8].mxu0 %vm355_vm1, %v339_v40  ;;  %2404 = vmatpush3.msra.mxu1 %v2361_v28 }
 0x192   :  { %2399 = vmatpush3.msra.mxu0 %v169_v30  ;;  %2405 = vmatprep.mubr.msk.f32.mxu1 %vm2636_vm0, %v2635_v14 }
 0x193   :  { %v655_v41 = vpop.trf.xlu0  ;;  %2413 = vmatprep.subr.mxu1 %v2635_v14  ;;  %2400 = vmatprep.mubr.msk.f32.mxu0 %vm2636_vm0, %v2635_v14 }
 0x194   :  { %2406 = vmatmul.mubr.msk.f32.vlgmr.msra.gmra.mrb[18].mxu1 %vm355_vm1, %v655_v41  ;;  %2408 = vmatprep.subr.mxu0 %v2635_v14 }
 0x195   :  { %2414 = vmatpush3.msra.mxu1 %v2378_v31  ;;  %2415 = vmatprep.mubr.msk.f32.mxu1 %vm2636_vm0, %v2635_v14 }
 0x196   :  { %2423 = vmatprep.subr.mxu1 %v2635_v14 }
 0x197   :  { %v865_v42 = vpop.trf.xlu1  ;;  %v550_v43 = vpop.trf.xlu0 }
 0x198   :  { %2401 = vmatmul.mubr.msk.f32.vlgmr.msra.gmra.mrb[10].mxu0 %vm355_vm1, %v550_v43  ;;  %2416 = vmatmul.mubr.msk.f32.vlgmr.msra.gmra.mrb[20].mxu1 %vm355_vm1, %v865_v42 }
 0x199   :  { %2409 = vmatpush3.msra.mxu0 %v284_v32  ;;  %2424 = vmatpush3.msra.mxu1 %v2381_v33 }
 0x19a   :  { %2410 = vmatprep.mubr.msk.f32.mxu0 %vm2636_vm0, %v2635_v14  ;;  %2418 = vmatprep.subr.mxu0 %v2635_v14 }
 0x19b   :  { %v760_v44 = vpop.trf.xlu1  ;;  %2425 = vmatprep.mubr.msk.f32.mxu1 %vm2636_vm0, %v2635_v14  ;;  %2433 = vmatprep.subr.mxu1 %v2635_v14 }
 0x19c   :  { %2411 = vmatmul.mubr.msk.f32.vlgmr.msra.gmra.mrb[12].mxu0 %vm355_vm1, %v760_v44  ;;  %v970_v45 = vpop.trf.xlu0 }
 0x19d   :  { %2419 = vmatpush3.msra.mxu0 %v294_v34  ;;  %2420 = vmatprep.mubr.msk.f32.mxu0 %vm2636_vm0, %v2635_v14 }
 0x19e   :  { %2428 = vmatprep.subr.mxu0 %v2635_v14 }
 0x19f   :  { %v1075_v46 = vpop.trf.xlu1 }
 0x1a0   :  { %2421 = vmatmul.mubr.msk.f32.vlgmr.msra.gmra.mrb[14].mxu0 %vm355_vm1, %v970_v45  ;;  %2426 = vmatmul.mubr.msk.f32.vlgmr.msra.gmra.mrb[22].mxu1 %vm355_vm1, %v1075_v46 }
 0x1a1   :  { %2434 = vmatpush3.xpose.msk.msra.mxu1 %vm355_vm1, %v2721_v16  ;;  %2435 = vmatprep.mubr.msk.f32.mxu1 %vm2636_vm0, %v2635_v14 }
 0x1a2   :  { %2443 = vmatprep.subr.mxu1 %v2635_v14  ;;  %2430 = vmatprep.mubr.msk.f32.mxu0 %vm2636_vm0, %v2635_v14 }
 0x1a4   :  { %2429 = vmatpush3.xpose.msk.msra.mxu0 %vm355_vm1, %v2723_v17 }
 0x1a5   :  { %2438 = vmatprep.subr.mxu0 %v2635_v14 }
 0x263   :  { %v530_v47 = vpop.f32.mrb[16].mxu1 }
 0x264   :  { %v425_v48 = vpop.f32.mrb[8].mxu0  ;;  %v2397_v49 = vpop.f32.mrb[17].mxu1  ;;  %v1167_v50 = vsel %vm355_vm1, %v530_v47, -inf }
 0x265   :  { %1168 = vmax.xlane.f32.xlu0 %v1167_v50  ;;  %v2392_v51 = vpop.f32.mrb[9].mxu0  ;;  %v1164_v52 = vsel %vm355_vm1, %v425_v48, -inf  ;;  %v1885_v49 = vld [vmem:[#allocation7 + $0x8] sm:$0xff] }
 0x266   :  { %1165 = vmax.xlane.f32.xlu1 %v1164_v52 }
 0x267   :  { %v740_v53 = vpop.f32.mrb[18].mxu1 }
 0x268   :  { %v2407_v54 = vpop.f32.mrb[19].mxu1  ;;  %v1173_v55 = vsel %vm355_vm1, %v740_v53, -inf }
 0x26a   :  { %1174 = vmax.xlane.f32.xlu1 %v1173_v55 }
 0x26b   :  { %v635_v56 = vpop.f32.mrb[10].mxu0  ;;  %v950_v57 = vpop.f32.mrb[20].mxu1 }
 0x26c   :  { %v2417_v58 = vpop.f32.mrb[21].mxu1  ;;  %v1170_v59 = vsel %vm355_vm1, %v635_v56, -inf  ;;  %v1179_v60 = vsel %vm355_vm1, %v950_v57, -inf  ;;  %v2402_v61 = vpop.f32.mrb[11].mxu0 }
 0x26d   :  { %1171 = vmax.xlane.f32.xlu0 %v1170_v59 }
 0x26e   :  { %1180 = vmax.xlane.f32.xlu1 %v1179_v60 }
 0x26f   :  { %v845_v62 = vpop.f32.mrb[12].mxu0 }
 0x270   :  { %v1176_v63 = vsel %vm355_vm1, %v845_v62, -inf  ;;  %v2412_v0 = vpop.f32.mrb[13].mxu0 }
 0x272   :  { %1177 = vmax.xlane.f32.xlu1 %v1176_v63 }
 0x273   :  { %v1055_v1 = vpop.f32.mrb[14].mxu0  ;;  %v1160_v2 = vpop.f32.mrb[22].mxu1 }
 0x274   :  { %v1182_v3 = vsel %vm355_vm1, %v1055_v1, -inf  ;;  %v1185_v4 = vsel %vm355_vm1, %v1160_v2, -inf  ;;  %v2422_v5 = vpop.f32.mrb[15].mxu0  ;;  %v2427_v6 = vpop.f32.mrb[23].mxu1 }
 0x275   :  { %1183 = vmax.xlane.f32.xlu0 %v1182_v3 }
 0x276   :  { %1186 = vmax.xlane.f32.xlu1 %v1185_v4 }
 0x2f2   :  { %v1169_v7 = vpop.xlane.xlu0 %1168 }
 0x2f3   :  { %v1189_v8 = vsub.f32 %v530_v47, %v1169_v7  ;;  %v1166_v9 = vpop.xlane.xlu1 %1165 }
 0x2f4   :  { %v1188_v10 = vsub.f32 %v425_v48, %v1166_v9 }
 0x2f5   :  { %v1198_v11 = vmul.f32 1.442695, %v1189_v8 }
 0x2f6   :  { %v1196_v12 = vmul.f32 1.442695, %v1188_v10 }
 0x2f7   :  { %2504 = vpow2.f32 %v1198_v11  ;;  %v1175_v13 = vpop.xlane.xlu1 %1174 }
 0x2f8   :  { %2506 = vpow2.f32 %v1196_v12  ;;  %v1191_v15 = vsub.f32 %v740_v53, %v1175_v13 }
 0x2fa   :  { %v1202_v16 = vmul.f32 1.442695, %v1191_v15  ;;  %v1172_v17 = vpop.xlane.xlu0 %1171 }
 0x2fb   :  { %v1190_v18 = vsub.f32 %v635_v56, %v1172_v17  ;;  %v1181_v19 = vpop.xlane.xlu1 %1180 }
 0x2fc   :  { %2508 = vpow2.f32 %v1202_v16  ;;  %v1193_v22 = vsub.f32 %v950_v57, %v1181_v19 }
 0x2fd   :  { %v1200_v23 = vmul.f32 1.442695, %v1190_v18 }
 0x2fe   :  { %v1206_v24 = vmul.f32 1.442695, %v1193_v22 }
 0x2ff   :  { %2510 = vpow2.f32 %v1200_v23  ;;  %v1178_v25 = vpop.xlane.xlu1 %1177 }
 0x300   :  { %2512 = vpow2.f32 %v1206_v24  ;;  %v1192_v26 = vsub.f32 %v845_v62, %v1178_v25  ;;  %v1886_v25 = vld [vmem:[#allocation7 + $0x10] sm:$0xff] }
 0x301   :  { %v2505_v27 = vpop.eup %2504 }
 0x302   :  { %v2507_v28 = vpop.eup %2506  ;;  %v1204_v29 = vmul.f32 1.442695, %v1192_v26  ;;  %2436 = vmatmul.mubr.msk.f32.vlgmr.msra.gmra.mrb[24].mxu1 %vm355_vm1, %v2505_v27  ;;  %v1184_v30 = vpop.xlane.xlu0 %1183  ;;  %v1215_v31 = vsel %vm355_vm1, %v2505_v27, 0.0 }
 0x303   :  { %2444 = vmatpush3.xpose.msk.msra.mxu1 %vm355_vm1, %v2725_v20  ;;  %v1194_v32 = vsub.f32 %v1055_v1, %v1184_v30  ;;  %2431 = vmatmul.mubr.msk.f32.vlgmr.msra.gmra.mrb[16].mxu0 %vm355_vm1, %v2507_v28  ;;  %v1187_v33 = vpop.xlane.xlu1 %1186  ;;  %v1212_v20 = vsel %vm355_vm1, %v2507_v28, 0.0 }
 0x304   :  { %2514 = vpow2.f32 %v1204_v29  ;;  %2439 = vmatpush3.xpose.msk.msra.mxu0 %vm355_vm1, %v2727_v21  ;;  %v1195_v34 = vsub.f32 %v1160_v2, %v1187_v33  ;;  %1216 = vadd.xlane.f32.xlu0 %v1215_v31 }
 0x305   :  { %v1208_v39 = vmul.f32 1.442695, %v1194_v32  ;;  %2445 = vmatprep.mubr.msk.f32.mxu1 %vm2636_vm0, %v2635_v14  ;;  %2453 = vmatprep.subr.mxu1 %v2635_v14 }
 0x306   :  { %v2509_v40 = vpop.eup %2508  ;;  %v1210_v41 = vmul.f32 1.442695, %v1195_v34  ;;  %2440 = vmatprep.mubr.msk.f32.mxu0 %vm2636_vm0, %v2635_v14  ;;  %2448 = vmatprep.subr.mxu0 %v2635_v14 }
 0x307   :  { %2516 = vpow2.f32 %v1208_v39  ;;  %2446 = vmatmul.mubr.msk.f32.vlgmr.msra.gmra.mrb[26].mxu1 %vm355_vm1, %v2509_v40 }
 0x308   :  { %2518 = vpow2.f32 %v1210_v41  ;;  %2454 = vmatpush3.xpose.msk.msra.mxu1 %vm355_vm1, %v2731_v35  ;;  %1213 = vadd.xlane.f32.xlu0 %v1212_v20 }
 0x309   :  { %v2511_v21 = vpop.eup %2510  ;;  %2455 = vmatprep.mubr.msk.f32.mxu1 %vm2636_vm0, %v2635_v14  ;;  %2463 = vmatprep.subr.mxu1 %v2635_v14 }
 0x30a   :  { %v2513_v42 = vpop.eup %2512  ;;  %2441 = vmatmul.mubr.msk.f32.vlgmr.msra.gmra.mrb[18].mxu0 %vm355_vm1, %v2511_v21  ;;  %v1218_v43 = vsel %vm355_vm1, %v2511_v21, 0.0 }
 0x30b   :  { %2449 = vmatpush3.xpose.msk.msra.mxu0 %vm355_vm1, %v2733_v36  ;;  %2456 = vmatmul.mubr.msk.f32.vlgmr.msra.gmra.mrb[28].mxu1 %vm355_vm1, %v2513_v42  ;;  %v1227_v44 = vsel %vm355_vm1, %v2513_v42, 0.0  ;;  %v1221_v36 = vsel %vm355_vm1, %v2509_v40, 0.0 }
 0x30c   :  { %2464 = vmatpush3.xpose.msk.msra.mxu1 %vm355_vm1, %v2735_v37  ;;  %1219 = vadd.xlane.f32.xlu0 %v1218_v43 }
 0x30d   :  { %1228 = vadd.xlane.f32.xlu1 %v1227_v44  ;;  %2450 = vmatprep.mubr.msk.f32.mxu0 %vm2636_vm0, %v2635_v14  ;;  %v1887_v44 = vld [vmem:[#allocation7 + $0x18] sm:$0xff] }
 0x30e   :  { %v2515_v35 = vpop.eup %2514  ;;  %2458 = vmatprep.subr.mxu0 %v2635_v14  ;;  %2465 = vmatprep.mubr.msk.f32.mxu1 %vm2636_vm0, %v2635_v14 }
 0x30f   :  { %2451 = vmatmul.mubr.msk.f32.vlgmr.msra.gmra.mrb[20].mxu0 %vm355_vm1, %v2515_v35  ;;  %v1224_v45 = vsel %vm355_vm1, %v2515_v35, 0.0 }
 0x310   :  { %2459 = vmatpush3.xpose.msk.msra.mxu0 %vm355_vm1, %v2737_v38  ;;  %1222 = vadd.xlane.f32.xlu0 %v1221_v36  ;;  %v1884_v38 = vld [vmem:[#allocation7] sm:$0xff] }
 0x311   :  { %v2517_v37 = vpop.eup %2516  ;;  %1225 = vadd.xlane.f32.xlu1 %v1224_v45  ;;  %2460 = vmatprep.mubr.msk.f32.mxu0 %vm2636_vm0, %v2635_v14 }
 0x312   :  { %v2519_v46 = vpop.eup %2518  ;;  %v1230_v47 = vsel %vm355_vm1, %v2517_v37, 0.0  ;;  %2468 = vmatprep.subr.mxu0 %v1885_v49 }
 0x313   :  { %2461 = vmatmul.mubr.msk.f32.vlgmr.msra.gmra.mrb[22].mxu0 %vm355_vm1, %v2517_v37  ;;  %2466 = vmatmul.mubr.msk.f32.vlgmr.msra.gmra.mrb[30].mxu1 %vm355_vm1, %v2519_v46  ;;  %v1233_v48 = vsel %vm355_vm1, %v2519_v46, 0.0 }
 0x314   :  { %2469 = vmatpush3.msra.mxu0 %v1885_v49 }
 0x315   :  { %1231 = vadd.xlane.f32.xlu1 %v1230_v47  ;;  %2473 = vmatprep.subr.mxu0 %v1884_v38 }
 0x319   :  { %1234 = vadd.xlane.f32.xlu1 %v1233_v48 }
 0x391   :  { %v1217_v50 = vpop.xlane.xlu0 %1216 }
 0x392   :  { %2520 = vrcp.f32 %v1217_v50 }
 0x395   :  { %v1214_v14 = vpop.xlane.xlu0 %1213 }
 0x399   :  { %v1220_v55 = vpop.xlane.xlu0 %1219 }
 0x39a   :  { %v1229_v51 = vpop.xlane.xlu1 %1228 }
 0x39b   :  { %2522 = vrcp.f32 %v1229_v51 }
 0x39c   :  { %v2521_v52 = vpop.eup %2520  ;;  %2524 = vrcp.f32 %v1214_v14 }
 0x39d   :  { %v1245_v53 = vmul.f32 %v2521_v52, %v1217_v50  ;;  %v1223_v59 = vpop.xlane.xlu0 %1222 }
 0x39e   :  { %v1226_v54 = vpop.xlane.xlu1 %1225 }
 0x39f   :  { %v1253_v56 = vsub.f32 2.0, %v1245_v53  ;;  %2526 = vrcp.f32 %v1226_v54 }
 0x3a0   :  { %2528 = vrcp.f32 %v1220_v55 }
 0x3a1   :  { %v1261_v60 = vmul.f32 %v2521_v52, %v1253_v56 }
 0x3a2   :  { %v1232_v62 = vpop.xlane.xlu1 %1231 }
 0x3a3   :  { %2530 = vrcp.f32 %v1232_v62 }
 0x3a4   :  { %2532 = vrcp.f32 %v1223_v59 }
 0x3a5   :  { %v2523_v57 = vpop.eup %2522 }
 0x3a6   :  { %v2525_v58 = vpop.eup %2524  ;;  %v1249_v61 = vmul.f32 %v2523_v57, %v1229_v51  ;;  %v1235_v12 = vpop.xlane.xlu1 %1234 }
 0x3a7   :  { %v1244_v0 = vmul.f32 %v2525_v58, %v1214_v14  ;;  %2534 = vrcp.f32 %v1235_v12  ;;  %v2277_v14 = vld [vmem:[%s2856_s3] ss:$0 sm:$0xff] }
 0x3a8   :  { %v1257_v5 = vsub.f32 2.0, %v1249_v61 }
 0x3a9   :  { %v2527_v6 = vpop.eup %2526  ;;  %v1252_v7 = vsub.f32 2.0, %v1244_v0 }
 0x3aa   :  { %v2529_v9 = vpop.eup %2528  ;;  %v1248_v11 = vmul.f32 %v2527_v6, %v1226_v54  ;;  %v1265_v15 = vmul.f32 %v2523_v57, %v1257_v5 }
 0x3ab   :  { %v1246_v16 = vmul.f32 %v2529_v9, %v1220_v55  ;;  %v1260_v17 = vmul.f32 %v2525_v58, %v1252_v7 }
 0x3ac   :  { %v1256_v26 = vsub.f32 2.0, %v1248_v11 }
 0x3ad   :  { %v2531_v27 = vpop.eup %2530  ;;  %v1254_v28 = vsub.f32 2.0, %v1246_v16 }
 0x3ae   :  { %v2533_v30 = vpop.eup %2532  ;;  %v1250_v32 = vmul.f32 %v2531_v27, %v1232_v62  ;;  %v1264_v33 = vmul.f32 %v2527_v6, %v1256_v26 }
 0x3af   :  { %v1247_v34 = vmul.f32 %v2533_v30, %v1223_v59  ;;  %v1262_v39 = vmul.f32 %v2529_v9, %v1254_v28 }
 0x3b0   :  { %v1258_v35 = vsub.f32 2.0, %v1250_v32 }
 0x3b1   :  { %v2535_v36 = vpop.eup %2534  ;;  %v1255_v45 = vsub.f32 2.0, %v1247_v34 }
 0x3b2   :  { %v1251_v37 = vmul.f32 %v2535_v36, %v1235_v12  ;;  %v1266_v46 = vmul.f32 %v2531_v27, %v1258_v35 }
 0x3b3   :  { %v1263_v47 = vmul.f32 %v2533_v30, %v1255_v45 }
 0x3d5   :  { %v1416_v63 = vpop.f32.mrb[24].mxu1 }
 0x3d6   :  { %v1877_v1 = vmul.f32 %v1416_v63, %v1261_v60  ;;  %v1340_v2 = vpop.f32.mrb[16].mxu0  ;;  %v2437_v3 = vpop.f32.mrb[25].mxu1 }
 0x3d7   :  { %v2432_v4 = vpop.f32.mrb[17].mxu0  ;;  %v1876_v24 = vmul.f32 %v1340_v2, %v1260_v17 }
 0x3d8   :  { %2470 = vmatprep.mubr.msk.f32.mxu0 %vm355_vm1, %v1877_v1 }
 0x3da   :  { %v1568_v8 = vpop.f32.mrb[26].mxu1 }
 0x3db   :  { %v2447_v10 = vpop.f32.mrb[27].mxu1  ;;  %v1879_v49 = vmul.f32 %v1568_v8, %v1263_v47 }
 0x3dd   :  { %v1492_v13 = vpop.f32.mrb[18].mxu0 }
 0x3de   :  { %v2442_v18 = vpop.f32.mrb[19].mxu0  ;;  %v1720_v19 = vpop.f32.mrb[28].mxu1  ;;  %v1878_v43 = vmul.f32 %v1492_v13, %v1262_v39 }
 0x3df   :  { %v1881_v22 = vmul.f32 %v1720_v19, %v1265_v15  ;;  %v2457_v23 = vpop.f32.mrb[29].mxu1 }
 0x3e1   :  { %2471 = vmatmul.mubr.msk.f32.vlgmr.msra.gmra.mrb[24].mxu0 %vm355_vm1, %v1881_v22 }
 0x3e2   :  { %2474 = vmatpush3.msra.mxu0 %v1884_v38  ;;  %v1644_v29 = vpop.f32.mrb[20].mxu0  ;;  %2475 = vmatprep.mubr.msk.f32.mxu0 %vm355_vm1, %v1876_v24  ;;  %v1259_v38 = vsub.f32 2.0, %v1251_v37 }
 0x3e3   :  { %v2452_v31 = vpop.f32.mrb[21].mxu0  ;;  %2478 = vmatprep.subr.mxu0 %v1886_v25  ;;  %v1880_v20 = vmul.f32 %v1644_v29, %v1264_v33 }
 0x3e4   :  { %v1267_v50 = vmul.f32 %v2535_v36, %v1259_v38 }
 0x3e6   :  { %v1796_v40 = vpop.f32.mrb[22].mxu0  ;;  %v1872_v41 = vpop.f32.mrb[30].mxu1 }
 0x3e7   :  { %v2462_v21 = vpop.f32.mrb[23].mxu0  ;;  %v2467_v42 = vpop.f32.mrb[31].mxu1  ;;  %v1882_v48 = vmul.f32 %v1796_v40, %v1266_v46  ;;  %v1883_v51 = vmul.f32 %v1872_v41, %v1267_v50 }
 0x3e9   :  { %2476 = vmatmul.mubr.msk.f32.vlgmr.msra.gmra.mrb[24].mxu0 %vm355_vm1, %v1880_v20 }
 0x3ea   :  { %2479 = vmatpush3.msra.mxu0 %v1886_v25  ;;  %2480 = vmatprep.mubr.msk.f32.mxu0 %vm355_vm1, %v1878_v43 }
 0x3eb   :  { %2483 = vmatprep.subr.mxu0 %v1887_v44 }
 0x3f1   :  { %2481 = vmatmul.mubr.msk.f32.vlgmr.msra.gmra.mrb[24].mxu0 %vm355_vm1, %v1882_v48 }
 0x3f2   :  { %2484 = vmatpush3.msra.mxu0 %v1887_v44  ;;  %2485 = vmatprep.mubr.msk.f32.mxu0 %vm355_vm1, %v1879_v49 }
 0x3f9   :  { %2486 = vmatmul.mubr.msk.f32.vlgmr.msra.gmra.mrb[24].mxu0 %vm355_vm1, %v1883_v51 }
 0x4cc   :  { %v2487_v52 = vpop.f32.mrb[24].mxu0 }
 0x4cd   :  { %v2224_v53 = vadd.f32 %v2487_v52, %v2277_v14  ;;  %v2205_v54 = vpop.f32.mrb[25].mxu0 }
 0x4ce   :  { %v2223_v55 = vadd.f32 %v2277_v14, %v2205_v54 }
 0x4cf   :  { %2226 = vst [vmem:[#allocation8 + $0x8] sm:$0xff] %v2224_v53 }
 0x4d0   :  { %2225 = vst [vmem:[#allocation8] sm:$0xff] %v2223_v55 }
 0x4d1   :  { %2613 = shalt.err (!%p2610_p0)
}
 0x4d2   :  { %s2614_s3 = scalar_lea.hbm %s2857_s4, 256 }
 0x4d3   :  { %p2615_p1 = scmp.ne.s32.totalorder %s2857_s4, %s2614_s3  ;;  %p2618_p2 = scmp.lt.u32.totalorder %s2614_s3, %s2857_s4 }
 0x4d5   :  { %p2620_p3 = pnand %p2618_p2, %p2615_p1 }
 0x4d7   :  { %2623 = shalt.err (!%p2620_p3)
}
 0x4d8   :  { %2238 = dma.vmem_to_hbm [thread:$0]  %s2233_s29, 256, %s2857_s4, [#allocation4], %s2632_s27, %s2632_s27, %s2633_s28  }
 0x4d9   :  { %2628 = dma.done.wait [#allocation4], 256  }
 0x4da   :  { %2629 = vsyncadd [#allocation4], 4294967040 }
 0x4db   :  { %2242 = vsyncpa [#allocation3], 1 }
 0x4dc   :  { %2243 = vsyncpa [#allocation6], 1 }
 0x4dd   :  { %2244 = vsyncpa [#allocation4], 1 }

</bundles_post_ra>
